<compile_context>
chip_gen: v6e
topology: v6e:2x2x1
jax: 0.10.0
libtpu: 0.0.40
codegen_flags: <defaults>
</compile_context>

<pallas_src>
import jax
import jax.numpy as jnp
from jax import lax
from jax.experimental import pallas as pl
from jax.experimental.pallas import tpu as pltpu


def _contrastive_kernel(t_ref, xm_ref, xu_ref, wem_ref, weu_ref, wpm_ref, wpu_ref,
                        logits_ref, fm_acc, fu_acc):
    """One step of the K-pipelined fused contrastive forward.

    Grid: (F // TK,) marked "arbitrary" (reduction over flattened image features).

    t_ref      : (1, 1)  f32  SMEM   temperature
    xm_ref     : (B, TK) f32  VMEM   masked images, flattened, K-chunk
    xu_ref     : (B, TK) f32  VMEM   unmasked images, flattened, K-chunk
    wem_ref    : (TK, E) bf16 VMEM   masked encoder weight, K-chunk
    weu_ref    : (TK, E) bf16 VMEM   unmasked encoder weight, K-chunk
    wpm_ref    : (E, P)  bf16 VMEM   W_masked   (resident: index_map -> (0, 0))
    wpu_ref    : (E, P)  bf16 VMEM   W_unmasked (resident)
    logits_ref : (B, B)  f32  VMEM   output (resident across the K axis)
    fm_acc     : (B, E)  f32  VMEM scratch   masked feature accumulator
    fu_acc     : (B, E)  f32  VMEM scratch   unmasked feature accumulator
    """
    k = pl.program_id(0)

    @pl.when(k == 0)
    def _init():
        fm_acc[...] = jnp.zeros_like(fm_acc)
        fu_acc[...] = jnp.zeros_like(fu_acc)

    # Encoder stage: per-path bf16 MXU matmuls, f32 accumulation.
    # Images are cast f32 -> bf16 in-kernel (no extra HBM round trip in the
    # wrapper); weights arrive bf16 already (one-time init cast), the astype is
    # then a no-op and only guards against f32 callers.
    fm_acc[...] += jnp.dot(xm_ref[...].astype(jnp.bfloat16),
                           wem_ref[...].astype(jnp.bfloat16),
                           preferred_element_type=jnp.float32)
    fu_acc[...] += jnp.dot(xu_ref[...].astype(jnp.bfloat16),
                           weu_ref[...].astype(jnp.bfloat16),
                           preferred_element_type=jnp.float32)

    @pl.when(k == pl.num_programs(0) - 1)
    def _finalize():
        # Projection stage (separate per-path matmuls; no block-diagonal fusion).
        em = jnp.dot(fm_acc[...].astype(jnp.bfloat16),
                     wpm_ref[...].astype(jnp.bfloat16),
                     preferred_element_type=jnp.float32)            # (B, P) f32
        eu = jnp.dot(fu_acc[...].astype(jnp.bfloat16),
                     wpu_ref[...].astype(jnp.bfloat16),
                     preferred_element_type=jnp.float32)            # (B, P) f32

        # Deferred L2 normalization via EUP rsqrt (no per-element divides).
        inv_m = lax.rsqrt(jnp.sum(em * em, axis=1, keepdims=True) + 1e-12)  # (B,1)
        inv_u = lax.rsqrt(jnp.sum(eu * eu, axis=1, keepdims=True) + 1e-12)  # (B,1)

        # Unmasked-side scale applied as a row scale before the bf16 cast
        # (avoids a sublane->lane relayout for a column-scale vector).
        eu_n = (eu * inv_u).astype(jnp.bfloat16)                    # (B, P) bf16
        em_b = em.astype(jnp.bfloat16)                              # (B, P) bf16

        # Logits: bf16 operands, f32 accumulation; contract axis 1 of BOTH
        # operands (A @ B^T) -> no materialized (P, B) transpose in the wrapper.
        # TODO(synk): confirm via pl.lower_as_mlir that Mosaic does not insert a
        # VMEM transpose for this contraction at production sizes.
        raw = lax.dot_general(em_b, eu_n, (((1,), (1,)), ((), ())),
                              preferred_element_type=jnp.float32)   # (B, B) f32

        # Masked-side scale deferred to a rank-1 row scale, fused with exp(t).
        scale = jnp.exp(t_ref[0, 0])
        # TODO(synk): if small B is a real deployment size, pad the logits last
        # dim to >= 128 and slice outside (lane-dense stores).
        logits_ref[...] = raw * (inv_m * scale)


def contrastive_forward(masked_images, unmasked_images,
                        we_masked, we_unmasked, w_masked, w_unmasked, t):
    """JAX wrapper: flatten NCHW images (reshape only — no cast, no concat) and
    launch the fused kernel with a pipelined K-grid over the feature axis."""
    B = masked_images.shape[0]
    xm = masked_images.reshape(B, -1)                 # (B, F) f32
    xu = unmasked_images.reshape(B, -1)               # (B, F) f32
    F = xm.shape[1]
    E = we_masked.shape[1]
    P = w_masked.shape[1]

    # Lane-dense K tile that divides F (falls back to a single step).
    tk = F
    for cand in (512, 256, 128):
        if F % cand == 0:
            tk = cand
            break
    grid_k = F // tk

    t_smem = jnp.reshape(t.astype(jnp.float32), (1, 1))

    flops = 2 * (2 * B * F * E) + 2 * (2 * B * E * P) + 2 * B * B * P
    bytes_accessed = int(sum(a.size * a.dtype.itemsize for a in
                             (xm, xu, we_masked, we_unmasked, w_masked, w_unmasked))
                         + B * B * 4)
    cost = pl.CostEstimate(flops=flops, transcendentals=2 * B + 1,
                           bytes_accessed=bytes_accessed)

    grid_spec = pltpu.PrefetchScalarGridSpec(
        num_scalar_prefetch=0,
        grid=(grid_k,),
        in_specs=[
            pl.BlockSpec(memory_space=pltpu.MemorySpace.SMEM),   # t (whole, SMEM)
            pl.BlockSpec((B, tk), lambda k: (0, k)),             # masked images
            pl.BlockSpec((B, tk), lambda k: (0, k)),             # unmasked images
            pl.BlockSpec((tk, E), lambda k: (k, 0)),             # encoder W (masked)
            pl.BlockSpec((tk, E), lambda k: (k, 0)),             # encoder W (unmasked)
            pl.BlockSpec((E, P), lambda k: (0, 0)),              # W_masked   (resident)
            pl.BlockSpec((E, P), lambda k: (0, 0)),              # W_unmasked (resident)
        ],
        out_specs=pl.BlockSpec((B, B), lambda k: (0, 0)),        # logits (resident)
        scratch_shapes=[pltpu.VMEM((B, E), jnp.float32),
                        pltpu.VMEM((B, E), jnp.float32)],
    )

    return pl.pallas_call(
        _contrastive_kernel,
        grid_spec=grid_spec,
        out_shape=jax.ShapeDtypeStruct((B, B), jnp.float32),
        compiler_params=pltpu.CompilerParams(
            dimension_semantics=("arbitrary",)),
        cost_estimate=cost,
    )(t_smem, xm, xu, we_masked, we_unmasked, w_masked, w_unmasked)


def _reference_same_numerics(masked_images, unmasked_images,
                             we_masked, we_unmasked, w_masked, w_unmasked, t):
    """Pure-JAX reference mirroring the kernel's exact dtype recipe
    (bf16 operands / f32 accumulation, deferred masked-side scale)."""
    B = masked_images.shape[0]
    xm = masked_images.reshape(B, -1).astype(jnp.bfloat16)
    xu = unmasked_images.reshape(B, -1).astype(jnp.bfloat16)
    mf = jnp.dot(xm, we_masked.astype(jnp.bfloat16), preferred_element_type=jnp.float32)
    uf = jnp.dot(xu, we_unmasked.astype(jnp.bfloat16), preferred_element_type=jnp.float32)
    me = jnp.dot(mf.astype(jnp.bfloat16), w_masked.astype(jnp.bfloat16),
                 preferred_element_type=jnp.float32)
    ue = jnp.dot(uf.astype(jnp.bfloat16), w_unmasked.astype(jnp.bfloat16),
                 preferred_element_type=jnp.float32)
    inv_m = lax.rsqrt(jnp.sum(me * me, axis=1, keepdims=True) + 1e-12)
    inv_u = lax.rsqrt(jnp.sum(ue * ue, axis=1, keepdims=True) + 1e-12)
    ue_n = (ue * inv_u).astype(jnp.bfloat16)
    raw = jnp.dot(me.astype(jnp.bfloat16), ue_n.T, preferred_element_type=jnp.float32)
    return raw * (inv_m * jnp.exp(t))


def _reference_module_f32(masked_images, unmasked_images,
                          we_masked, we_unmasked, w_masked, w_unmasked, t):
    """Module-faithful full-f32 reference (normalize-then-matmul, as in PyTorch)."""
    B = masked_images.shape[0]
    mf = masked_images.reshape(B, -1) @ we_masked
    uf = unmasked_images.reshape(B, -1) @ we_unmasked
    me = mf @ w_masked
    ue = uf @ w_unmasked
    me = me / jnp.linalg.norm(me, axis=1, keepdims=True)
    ue = ue / jnp.linalg.norm(ue, axis=1, keepdims=True)
    return (me @ ue.T) * jnp.exp(t)


if __name__ == "__main__":
    # Small shapes consistent with the module defaults.
    B, C, H, W = 8, 4, 16, 16           # images: NCHW
    EMBED_DIM = 64                      # embed_dim
    PROJECTION_DIM = 1024               # projection_dim
    FLAT = C * H * W                    # 1024

    key = jax.random.PRNGKey(0)
    k1, k2, k3, k4, k5, k6 = jax.random.split(key, 6)

    masked_images = jax.random.normal(k1, (B, C, H, W), dtype=jnp.float32)
    unmasked_images = jax.random.normal(k2, (B, C, H, W), dtype=jnp.float32)

    # Deterministic synthetic parameters (stand-in for encoder + head weights).
    we_masked_f32 = jax.random.normal(k3, (FLAT, EMBED_DIM), dtype=jnp.float32) * 0.02
    we_unmasked_f32 = jax.random.normal(k4, (FLAT, EMBED_DIM), dtype=jnp.float32) * 0.02
    # nn.Linear(embed_dim, projection_dim, bias=False) weight is (P, E); forward
    # computes x @ W.T, so we store the transposed (E, P) matrix directly.
    w_masked_f32 = jax.random.normal(k5, (EMBED_DIM, PROJECTION_DIM), dtype=jnp.float32) * 0.05
    w_unmasked_f32 = jax.random.normal(k6, (EMBED_DIM, PROJECTION_DIM), dtype=jnp.float32) * 0.05
    t = jnp.float32(2.0)                # self.t = nn.Parameter(torch.tensor(2.0))

    # One-time init cast of the static weights to the MXU operand dtype
    # (done once here, never per forward call).
    we_masked = we_masked_f32.astype(jnp.bfloat16)
    we_unmasked = we_unmasked_f32.astype(jnp.bfloat16)
    w_masked = w_masked_f32.astype(jnp.bfloat16)
    w_unmasked = w_unmasked_f32.astype(jnp.bfloat16)

    logits = contrastive_forward(masked_images, unmasked_images,
                                 we_masked, we_unmasked, w_masked, w_unmasked, t)
    logits = jax.block_until_ready(logits)

    assert logits.shape == (B, B)
    assert bool(jnp.all(jnp.isfinite(logits)))

    # Tight check against a reference with the same numeric recipe.
    ref_same = _reference_same_numerics(masked_images, unmasked_images,
                                        we_masked, we_unmasked, w_masked, w_unmasked, t)
    assert jnp.allclose(logits, ref_same, atol=2e-3, rtol=2e-3), \
        float(jnp.max(jnp.abs(logits - ref_same)))

    # Looser check against the module-faithful f32 reference.
    ref_f32 = _reference_module_f32(masked_images, unmasked_images,
                                    we_masked_f32, we_unmasked_f32,
                                    w_masked_f32, w_unmasked_f32, t)
    assert jnp.allclose(logits, ref_f32, atol=3e-2, rtol=3e-2), \
        float(jnp.max(jnp.abs(logits - ref_f32)))

    print("KERNEL_OK")
</pallas_src>

<mosaic_0001>
module attributes {stable_mosaic.version = 11 : i64} {
  func.func @_contrastive_kernel(%arg0: i32, %arg1: memref<1x1xf32, #tpu.memory_space<smem>>, %arg2: memref<8x512xf32, #tpu.memory_space<vmem>>, %arg3: memref<8x512xf32, #tpu.memory_space<vmem>>, %arg4: memref<512x64xbf16, #tpu.memory_space<vmem>>, %arg5: memref<512x64xbf16, #tpu.memory_space<vmem>>, %arg6: memref<64x1024xbf16, #tpu.memory_space<vmem>>, %arg7: memref<64x1024xbf16, #tpu.memory_space<vmem>>, %arg8: memref<8x8xf32, #tpu.memory_space<vmem>>, %arg9: memref<8x64xf32, #tpu.memory_space<vmem>>, %arg10: memref<8x64xf32, #tpu.memory_space<vmem>>) attributes {dimension_semantics = [#tpu.dimension_semantics<arbitrary>], iteration_bounds = array<i64: 2>, scalar_prefetch = 0 : i64, scratch_operands = 2 : i64, tpu.core_type = #tpu.core_type<tc>, window_params = [{transform_indices = @transform_0, window_bounds = array<i64: 1, 1>}, {transform_indices = @transform_1, window_bounds = array<i64: 8, 512>}, {transform_indices = @transform_2, window_bounds = array<i64: 8, 512>}, {transform_indices = @transform_3, window_bounds = array<i64: 512, 64>}, {transform_indices = @transform_4, window_bounds = array<i64: 512, 64>}, {pipeline_mode = #tpu.pipeline_mode<synchronous>, transform_indices = @transform_5, window_bounds = array<i64: 64, 1024>}, {pipeline_mode = #tpu.pipeline_mode<synchronous>, transform_indices = @transform_6, window_bounds = array<i64: 64, 1024>}, {pipeline_mode = #tpu.pipeline_mode<synchronous>, transform_indices = @transform_7, window_bounds = array<i64: 8, 8>}]} {
    %c0_i32 = arith.constant 0 : i32
    %0 = arith.cmpi eq, %arg0, %c0_i32 : i32
    %1 = arith.extui %0 : i1 to i32
    %c0_i32_0 = arith.constant 0 : i32
    %2 = arith.cmpi ne, %1, %c0_i32_0 : i32
    scf.if %2 {
      %cst_18 = arith.constant 0.000000e+00 : f32
      %20 = vector.broadcast %cst_18 : f32 to vector<8x64xf32>
      %c0_19 = arith.constant 0 : index
      %c0_20 = arith.constant 0 : index
      %21 = vector.load %arg9[%c0_19, %c0_20] : memref<8x64xf32, #tpu.memory_space<vmem>>, vector<8x64xf32>
      tpu.vector_store %arg9[%c0_19, %c0_20], %20 {strides = array<i32>} : memref<8x64xf32, #tpu.memory_space<vmem>>, vector<8x64xf32>,
      %cst_21 = arith.constant 0.000000e+00 : f32
      %22 = vector.broadcast %cst_21 : f32 to vector<8x64xf32>
      %c0_22 = arith.constant 0 : index
      %c0_23 = arith.constant 0 : index
      %23 = vector.load %arg10[%c0_22, %c0_23] : memref<8x64xf32, #tpu.memory_space<vmem>>, vector<8x64xf32>
      tpu.vector_store %arg10[%c0_22, %c0_23], %22 {strides = array<i32>} : memref<8x64xf32, #tpu.memory_space<vmem>>, vector<8x64xf32>,
    } else {
    }
    %c0 = arith.constant 0 : index
    %c0_1 = arith.constant 0 : index
    %3 = vector.load %arg9[%c0, %c0_1] : memref<8x64xf32, #tpu.memory_space<vmem>>, vector<8x64xf32>
    %c0_2 = arith.constant 0 : index
    %c0_3 = arith.constant 0 : index
    %4 = vector.load %arg2[%c0_2, %c0_3] : memref<8x512xf32, #tpu.memory_space<vmem>>, vector<8x512xf32>
    %5 = arith.truncf %4 : vector<8x512xf32> to vector<8x512xbf16>
    %c0_4 = arith.constant 0 : index
    %c0_5 = arith.constant 0 : index
    %6 = vector.load %arg4[%c0_4, %c0_5] : memref<512x64xbf16, #tpu.memory_space<vmem>>, vector<512x64xbf16>
    %cst = arith.constant dense<0.000000e+00> : vector<8x64xf32>
    %7 = tpu.matmul %5, %6, %cst {dimension_numbers = #tpu.dot_dimension_numbers<[1], [0], [0], [1], [0, 0, 1, 1], [], []>} : vector<8x512xbf16>, vector<512x64xbf16>, vector<8x64xf32> -> vector<8x64xf32>
    %8 = arith.addf %3, %7 : vector<8x64xf32>
    %c0_6 = arith.constant 0 : index
    %c0_7 = arith.constant 0 : index
    %9 = vector.load %arg9[%c0_6, %c0_7] : memref<8x64xf32, #tpu.memory_space<vmem>>, vector<8x64xf32>
    tpu.vector_store %arg9[%c0_6, %c0_7], %8 {strides = array<i32>} : memref<8x64xf32, #tpu.memory_space<vmem>>, vector<8x64xf32>,
    %c0_8 = arith.constant 0 : index
    %c0_9 = arith.constant 0 : index
    %10 = vector.load %arg10[%c0_8, %c0_9] : memref<8x64xf32, #tpu.memory_space<vmem>>, vector<8x64xf32>
    %c0_10 = arith.constant 0 : index
    %c0_11 = arith.constant 0 : index
    %11 = vector.load %arg3[%c0_10, %c0_11] : memref<8x512xf32, #tpu.memory_space<vmem>>, vector<8x512xf32>
    %12 = arith.truncf %11 : vector<8x512xf32> to vector<8x512xbf16>
    %c0_12 = arith.constant 0 : index
    %c0_13 = arith.constant 0 : index
    %13 = vector.load %arg5[%c0_12, %c0_13] : memref<512x64xbf16, #tpu.memory_space<vmem>>, vector<512x64xbf16>
    %cst_14 = arith.constant dense<0.000000e+00> : vector<8x64xf32>
    %14 = tpu.matmul %12, %13, %cst_14 {dimension_numbers = #tpu.dot_dimension_numbers<[1], [0], [0], [1], [0, 0, 1, 1], [], []>} : vector<8x512xbf16>, vector<512x64xbf16>, vector<8x64xf32> -> vector<8x64xf32>
    %15 = arith.addf %10, %14 : vector<8x64xf32>
    %c0_15 = arith.constant 0 : index
    %c0_16 = arith.constant 0 : index
    %16 = vector.load %arg10[%c0_15, %c0_16] : memref<8x64xf32, #tpu.memory_space<vmem>>, vector<8x64xf32>
    tpu.vector_store %arg10[%c0_15, %c0_16], %15 {strides = array<i32>} : memref<8x64xf32, #tpu.memory_space<vmem>>, vector<8x64xf32>,
    %c1_i32 = arith.constant 1 : i32
    %17 = arith.cmpi eq, %arg0, %c1_i32 : i32
    %18 = arith.extui %17 : i1 to i32
    %c0_i32_17 = arith.constant 0 : i32
    %19 = arith.cmpi ne, %18, %c0_i32_17 : i32
    scf.if %19 {
      %c0_18 = arith.constant 0 : index
      %c0_19 = arith.constant 0 : index
      %20 = vector.load %arg9[%c0_18, %c0_19] : memref<8x64xf32, #tpu.memory_space<vmem>>, vector<8x64xf32>
      %21 = arith.truncf %20 : vector<8x64xf32> to vector<8x64xbf16>
      %c0_20 = arith.constant 0 : index
      %c0_21 = arith.constant 0 : index
      %22 = vector.load %arg6[%c0_20, %c0_21] : memref<64x1024xbf16, #tpu.memory_space<vmem>>, vector<64x1024xbf16>
      %cst_22 = arith.constant dense<0.000000e+00> : vector<8x1024xf32>
      %23 = tpu.matmul %21, %22, %cst_22 {dimension_numbers = #tpu.dot_dimension_numbers<[1], [0], [0], [1], [0, 0, 1, 1], [], []>} : vector<8x64xbf16>, vector<64x1024xbf16>, vector<8x1024xf32> -> vector<8x1024xf32>
      %c0_23 = arith.constant 0 : index
      %c0_24 = arith.constant 0 : index
      %24 = vector.load %arg10[%c0_23, %c0_24] : memref<8x64xf32, #tpu.memory_space<vmem>>, vector<8x64xf32>
      %25 = arith.truncf %24 : vector<8x64xf32> to vector<8x64xbf16>
      %c0_25 = arith.constant 0 : index
      %c0_26 = arith.constant 0 : index
      %26 = vector.load %arg7[%c0_25, %c0_26] : memref<64x1024xbf16, #tpu.memory_space<vmem>>, vector<64x1024xbf16>
      %cst_27 = arith.constant dense<0.000000e+00> : vector<8x1024xf32>
      %27 = tpu.matmul %25, %26, %cst_27 {dimension_numbers = #tpu.dot_dimension_numbers<[1], [0], [0], [1], [0, 0, 1, 1], [], []>} : vector<8x64xbf16>, vector<64x1024xbf16>, vector<8x1024xf32> -> vector<8x1024xf32>
      %28 = arith.mulf %23, %23 : vector<8x1024xf32>
      %cst_28 = arith.constant dense<0.000000e+00> : vector<8xf32>
      %29 = vector.multi_reduction <add>, %28, %cst_28 [1] : vector<8x1024xf32> to vector<8xf32>
      %30 = vector.shape_cast %29 : vector<8xf32> to vector<8x1xf32>
      %cst_29 = arith.constant 9.99999996E-13 : f32
      %31 = vector.broadcast %cst_29 : f32 to vector<8x1xf32>
      %32 = arith.addf %30, %31 : vector<8x1xf32>
      %33 = math.rsqrt %32 : vector<8x1xf32>
      %34 = arith.mulf %27, %27 : vector<8x1024xf32>
      %cst_30 = arith.constant dense<0.000000e+00> : vector<8xf32>
      %35 = vector.multi_reduction <add>, %34, %cst_30 [1] : vector<8x1024xf32> to vector<8xf32>
      %36 = vector.shape_cast %35 : vector<8xf32> to vector<8x1xf32>
      %cst_31 = arith.constant 9.99999996E-13 : f32
      %37 = vector.broadcast %cst_31 : f32 to vector<8x1xf32>
      %38 = arith.addf %36, %37 : vector<8x1xf32>
      %39 = math.rsqrt %38 : vector<8x1xf32>
      %40 = vector.broadcast %39 : vector<8x1xf32> to vector<8x1024xf32>
      %41 = arith.mulf %27, %40 : vector<8x1024xf32>
      %42 = arith.truncf %41 : vector<8x1024xf32> to vector<8x1024xbf16>
      %43 = arith.truncf %23 : vector<8x1024xf32> to vector<8x1024xbf16>
      %cst_32 = arith.constant dense<0.000000e+00> : vector<8x8xf32>
      %44 = tpu.matmul %43, %42, %cst_32 {dimension_numbers = #tpu.dot_dimension_numbers<[1], [1], [0], [0], [0, 0, 1, 0], [], []>} : vector<8x1024xbf16>, vector<8x1024xbf16>, vector<8x8xf32> -> vector<8x8xf32>
      %c0_33 = arith.constant 0 : index
      %c0_34 = arith.constant 0 : index
      %45 = memref.load %arg1[%c0_33, %c0_34] : memref<1x1xf32, #tpu.memory_space<smem>>
      %46 = math.exp %45 : f32
      %47 = vector.broadcast %46 : f32 to vector<8x1xf32>
      %48 = arith.mulf %33, %47 : vector<8x1xf32>
      %49 = vector.broadcast %48 : vector<8x1xf32> to vector<8x8xf32>
      %50 = arith.mulf %44, %49 : vector<8x8xf32>
      %c0_35 = arith.constant 0 : index
      %c0_36 = arith.constant 0 : index
      %51 = vector.load %arg8[%c0_35, %c0_36] : memref<8x8xf32, #tpu.memory_space<vmem>>, vector<8x8xf32>
      tpu.vector_store %arg8[%c0_35, %c0_36], %50 {strides = array<i32>} : memref<8x8xf32, #tpu.memory_space<vmem>>, vector<8x8xf32>,
    } else {
    }
    return
  }
  func.func @transform_0(%arg0: i32) -> (i32, i32) {
    %c0_i32 = arith.constant 0 : i32
    %c0_i32_0 = arith.constant 0 : i32
    %c0_i32_1 = arith.constant 0 : i32
    return %c0_i32, %c0_i32_0 : i32, i32
  }
  func.func @transform_1(%arg0: i32) -> (i32, i32) {
    %c0_i32 = arith.constant 0 : i32
    %c0_i32_0 = arith.constant 0 : i32
    return %c0_i32, %arg0 : i32, i32
  }
  func.func @transform_2(%arg0: i32) -> (i32, i32) {
    %c0_i32 = arith.constant 0 : i32
    %c0_i32_0 = arith.constant 0 : i32
    return %c0_i32, %arg0 : i32, i32
  }
  func.func @transform_3(%arg0: i32) -> (i32, i32) {
    %c0_i32 = arith.constant 0 : i32
    %c0_i32_0 = arith.constant 0 : i32
    return %arg0, %c0_i32 : i32, i32
  }
  func.func @transform_4(%arg0: i32) -> (i32, i32) {
    %c0_i32 = arith.constant 0 : i32
    %c0_i32_0 = arith.constant 0 : i32
    return %arg0, %c0_i32 : i32, i32
  }
  func.func @transform_5(%arg0: i32) -> (i32, i32) {
    %c0_i32 = arith.constant 0 : i32
    %c0_i32_0 = arith.constant 0 : i32
    %c0_i32_1 = arith.constant 0 : i32
    return %c0_i32, %c0_i32_0 : i32, i32
  }
  func.func @transform_6(%arg0: i32) -> (i32, i32) {
    %c0_i32 = arith.constant 0 : i32
    %c0_i32_0 = arith.constant 0 : i32
    %c0_i32_1 = arith.constant 0 : i32
    return %c0_i32, %c0_i32_0 : i32, i32
  }
  func.func @transform_7(%arg0: i32) -> (i32, i32) {
    %c0_i32 = arith.constant 0 : i32
    %c0_i32_0 = arith.constant 0 : i32
    %c0_i32_1 = arith.constant 0 : i32
    return %c0_i32, %c0_i32_0 : i32, i32
  }
}

</mosaic_0001>

<bundles_post_ra>
// kernel: tpu_custom_call.1
= control target key start
LH: loop header
LB: loop body
LE: loop exit
PB: predicated region body
PF: predicated region fallthrough
CT: control target
= control target key end

     0   :  { %s2863_s0 = inlined_call_operand.<no memory space> [shape: f32[1,1], index: 0, kind: input, shape index: {}]   ;;  %s2864_s1 = inlined_call_operand.vmem [shape: f32[8,1024], index: 1, kind: input, shape index: {}]   ;;  %s2865_s2 = inlined_call_operand.vmem [shape: f32[8,1024], index: 2, kind: input, shape index: {}]   ;;  %s2866_s3 = inlined_call_operand.vmem [shape: bf16[1024,64], index: 3, kind: input, shape index: {}]   ;;  %s2867_s4 = inlined_call_operand.vmem [shape: bf16[1024,64], index: 4, kind: input, shape index: {}]   ;;  %s2868_s5 = inlined_call_operand.vmem [shape: bf16[64,1024], index: 5, kind: input, shape index: {}]   ;;  %s2869_s6 = inlined_call_operand.vmem [shape: bf16[64,1024], index: 6, kind: input, shape index: {}]   ;;  %s2870_s7 = inlined_call_operand.hbm [shape: f32[8,8], index: 7, kind: output, shape index: {}]  }
   0x1   :  { %12 = sst [smem:[#allocation4]] %s2863_s0 }
   0x2   :  { %13 = vsyncpa [#allocation6], 0  ;;  %s2490_s26 = smov 0  }
   0x3 LB: > { %s2496_s27 = sadd.s32 4294967295, %s2442_s26   ;;  %p2080_p0 = scmp.ge.s32.totalorder %s2442_s26, 1  ;;  %s2442_s26 = sphi %s2490_s26, %s19_s26  }
   0x4   : > { %p268_p1 = scmp.lt.s32.totalorder %s2442_s26, 3 }
   0x6   : > { %p269_p2 = pnand %p2080_p0, %p268_p1 }
   0x7   : > { %s2081_s0 = sshll.u32 (!%p269_p2), %s2496_s27, 2  ;;  %s2085_s28 = sshll.u32 (!%p269_p2), %s2496_s27, 6 }
   0x8   : > { %272 = sbr.rel (%p269_p2) target bundleno = 953 (0x3b9), region = 48  ;;  %p311_p3 = scmp.lt.s32.totalorder (!%p269_p2), %s2081_s0, 7 }
   0x9   : > { %p323_p4 = scmp.lt.s32.totalorder (!%p269_p2), %s2085_s28, 127  ;;  %p2089_p5 = scmp.ne.s32.totalorder (!%p269_p2), %s2496_s27, 0 }
   0xd   : > { %s2872_s0 = smov (!%p311_p3, %s2081_s0), 7  ;;  %s2874_s28 = smov (!%p323_p4, %s2085_s28), 127 }
   0xe   : > { %s2082_s29 = sshll.u32 %s2872_s0, 3  ;;  %s2086_s13 = sshll.u32 %s2874_s28, 2 }
   0xf   : > { %s2505_s9 = scalar_lea.vmem %s2864_s1, %s2082_s29  ;;  %s2510_s12 = scalar_lea.vmem %s2865_s2, %s2082_s29 }
  0x10   : > { %s2515_s16 = scalar_lea.vmem %s2866_s3, %s2086_s13  ;;  %s2520_s19 = scalar_lea.vmem %s2867_s4, %s2086_s13 }
  0x11   : > { %338 = sbr.rel (%p2089_p5) target bundleno = 24 (0x18), region = 52 }
  0x16   : > { %vm339_vm0 = vcmask 523264   ;;  %v2444_v0 = vmov 0.0  }
  0x17   : > { %340 = vst.msk [vmem:[#allocation2] sm:$0xff] %vm339_vm0, %v2444_v0  ;;  %341 = vst.msk [vmem:[#allocation3] sm:$0xff] %vm339_vm0, %v2444_v0 }
  0x18 PF: > { %v2338_v1 = vld [vmem:[%s2515_s16 + $0x78] sm:$0xff]   ;;  %v2342_v5 = vld [vmem:[%s2515_s16 + $0x70] sm:$0xff]   ;;  %v2346_v9 = vld [vmem:[%s2515_s16 + $0x68] sm:$0xff]   ;;  %vm688_vm1 = vcmask 523264   ;;  %p2154_p6 = scmp.ne.s32.totalorder %s2496_s27, 1 }
  0x19   : > { %v2339_v2 = vld [vmem:[%s2515_s16 + $0xf8] sm:$0xff]   ;;  %2231 = vmatprep.subr.bf16.mxu0 %v2338_v1  ;;  %v2343_v6 = vld [vmem:[%s2515_s16 + $0xf0] sm:$0xff]   ;;  %v2347_v10 = vld [vmem:[%s2515_s16 + $0xe8] sm:$0xff]  }
  0x1a   : > { %v2340_v3 = vld [vmem:[%s2515_s16 + $0x38] sm:$0xff]   ;;  %2253 = vmatprep.subr.bf16.mxu1 %v2339_v2  ;;  %v2344_v7 = vld [vmem:[%s2515_s16 + $0x30] sm:$0xff]   ;;  %v2348_v11 = vld [vmem:[%s2515_s16 + $0x28] sm:$0xff]  }
  0x1b   : > { %v2341_v4 = vld [vmem:[%s2515_s16 + $0xb8] sm:$0xff]   ;;  %2232 = vmatpush3.bf16.msra.mxu0 %v2340_v3  ;;  %v2345_v8 = vld [vmem:[%s2515_s16 + $0xb0] sm:$0xff]   ;;  %v2349_v12 = vld [vmem:[%s2515_s16 + $0xa8] sm:$0xff]  }
  0x1c   : > { %2254 = vmatpush3.bf16.msra.mxu1 %v2341_v4  ;;  %2233 = vmatprep.subr.bf16.mxu0 %v2342_v5  ;;  %v2350_v13 = vld [vmem:[%s2515_s16 + $0x60] sm:$0xff]   ;;  %v2354_v17 = vld [vmem:[%s2515_s16 + $0x58] sm:$0xff]   ;;  %v2358_v21 = vld [vmem:[%s2515_s16 + $0x50] sm:$0xff]  }
  0x1d   : > { %2255 = vmatprep.subr.bf16.mxu1 %v2343_v6  ;;  %v2351_v14 = vld [vmem:[%s2515_s16 + $0xe0] sm:$0xff]   ;;  %v2355_v18 = vld [vmem:[%s2515_s16 + $0xd8] sm:$0xff]   ;;  %v2359_v22 = vld [vmem:[%s2515_s16 + $0xd0] sm:$0xff]  }
  0x1e   : > { %v2352_v15 = vld [vmem:[%s2515_s16 + $0x20] sm:$0xff]   ;;  %v2356_v19 = vld [vmem:[%s2515_s16 + $0x18] sm:$0xff]   ;;  %v2360_v23 = vld [vmem:[%s2515_s16 + $0x10] sm:$0xff]  }
  0x1f   : > { %2234 = vmatpush3.bf16.msra.mxu0 %v2344_v7  ;;  %v2353_v16 = vld [vmem:[%s2515_s16 + $0xa0] sm:$0xff]   ;;  %v2357_v20 = vld [vmem:[%s2515_s16 + $0x98] sm:$0xff]   ;;  %v2361_v24 = vld [vmem:[%s2515_s16 + $0x90] sm:$0xff]  }
  0x20   : > { %2256 = vmatpush3.bf16.msra.mxu1 %v2345_v8  ;;  %2235 = vmatprep.subr.bf16.mxu0 %v2346_v9  ;;  %v2362_v25 = vld [vmem:[%s2515_s16 + $0x48] sm:$0xff]   ;;  %v2366_v29 = vld [vmem:[%s2515_s16 + $0x40] sm:$0xff]   ;;  %v346_v34 = vld [vmem:[%s2505_s9 + $0x18] sm:$0xff] }
  0x21   : > { %2257 = vmatprep.subr.bf16.mxu1 %v2347_v10  ;;  %v2363_v26 = vld [vmem:[%s2515_s16 + $0xc8] sm:$0xff]   ;;  %v2367_v30 = vld [vmem:[%s2515_s16 + $0xc0] sm:$0xff]   ;;  %v350_v37 = vpack.c.bf16 %v346_v34, %v346_v34  ;;  %v345_v39 = vld [vmem:[%s2505_s9 + $0x10] sm:$0xff] }
  0x22   : > { %v2364_v27 = vld [vmem:[%s2515_s16 + $0x8] sm:$0xff]   ;;  %v2368_v31 = vld [vmem:[%s2515_s16] sm:$0xff]   ;;  %v349_v40 = vpack.c.bf16 %v345_v39, %v345_v39  ;;  %v2370_v41 = vld [vmem:[%s2520_s19 + $0x78] sm:$0xff]  }
  0x23   : > { %2236 = vmatpush3.bf16.msra.mxu0 %v2348_v11  ;;  %v2365_v28 = vld [vmem:[%s2515_s16 + $0x88] sm:$0xff]   ;;  %v2369_v32 = vld [vmem:[%s2515_s16 + $0x80] sm:$0xff]   ;;  %679 = vmatprep.mubr.bf16.mxu1 %v350_v37  ;;  %v2371_v42 = vld [vmem:[%s2520_s19 + $0xf8] sm:$0xff]   ;;  %s1985_s16 = sld [smem:[#allocation4]] (!%p2154_p6) }
  0x24   : > { %2258 = vmatpush3.bf16.msra.mxu1 %v2349_v12  ;;  %2237 = vmatprep.subr.bf16.mxu0 %v2350_v13  ;;  %v344_v33 = vld [vmem:[%s2505_s9 + $0x8] sm:$0xff]  ;;  %v343_v35 = vld [vmem:[%s2505_s9] sm:$0xff]  ;;  %v2372_v43 = vld [vmem:[%s2520_s19 + $0x38] sm:$0xff]  }
  0x25   : > { %2259 = vmatprep.subr.bf16.mxu1 %v2351_v14  ;;  %v348_v36 = vpack.c.bf16 %v344_v33, %v344_v33  ;;  %v347_v38 = vpack.c.bf16 %v343_v35, %v343_v35  ;;  %v2373_v44 = vld [vmem:[%s2520_s19 + $0xb8] sm:$0xff]   ;;  %v2374_v45 = vld [vmem:[%s2520_s19 + $0x70] sm:$0xff]   ;;  %v2378_v49 = vld [vmem:[%s2520_s19 + $0x68] sm:$0xff]  }
  0x26   : > { %v2375_v46 = vld [vmem:[%s2520_s19 + $0xf0] sm:$0xff]   ;;  %v2379_v50 = vld [vmem:[%s2520_s19 + $0xe8] sm:$0xff]   ;;  %v2382_v53 = vld [vmem:[%s2520_s19 + $0x60] sm:$0xff]  }
  0x27   : > { %2238 = vmatpush3.bf16.msra.mxu0 %v2352_v15  ;;  %639 = vmatprep.mubr.bf16.mxu0 %v348_v36  ;;  %v2376_v47 = vld [vmem:[%s2520_s19 + $0x30] sm:$0xff]   ;;  %v2380_v51 = vld [vmem:[%s2520_s19 + $0x28] sm:$0xff]   ;;  %v2383_v54 = vld [vmem:[%s2520_s19 + $0xe0] sm:$0xff]  }
  0x28   : > { %2260 = vmatpush3.bf16.msra.mxu1 %v2353_v16  ;;  %2239 = vmatprep.subr.bf16.mxu0 %v2354_v17  ;;  %v2377_v48 = vld [vmem:[%s2520_s19 + $0xb0] sm:$0xff]   ;;  %v2381_v52 = vld [vmem:[%s2520_s19 + $0xa8] sm:$0xff]   ;;  %v2384_v55 = vld [vmem:[%s2520_s19 + $0x20] sm:$0xff]  }
  0x29   : > { %2261 = vmatprep.subr.bf16.mxu1 %v2355_v18  ;;  %v2385_v56 = vld [vmem:[%s2520_s19 + $0xa0] sm:$0xff]   ;;  %v2386_v57 = vld [vmem:[%s2520_s19 + $0x58] sm:$0xff]   ;;  %v2390_v61 = vld [vmem:[%s2520_s19 + $0x50] sm:$0xff]  }
  0x2a   : > { %v2387_v58 = vld [vmem:[%s2520_s19 + $0xd8] sm:$0xff]   ;;  %v2391_v62 = vld [vmem:[%s2520_s19 + $0xd0] sm:$0xff]   ;;  %v2394_v1 = vld [vmem:[%s2520_s19 + $0x48] sm:$0xff]  }
  0x2b   : > { %2240 = vmatpush3.bf16.msra.mxu0 %v2356_v19  ;;  %v2388_v59 = vld [vmem:[%s2520_s19 + $0x18] sm:$0xff]   ;;  %v2392_v63 = vld [vmem:[%s2520_s19 + $0x10] sm:$0xff]   ;;  %v2395_v2 = vld [vmem:[%s2520_s19 + $0xc8] sm:$0xff]  }
  0x2c   : > { %2262 = vmatpush3.bf16.msra.mxu1 %v2357_v20  ;;  %2241 = vmatprep.subr.bf16.mxu0 %v2358_v21  ;;  %v2389_v60 = vld [vmem:[%s2520_s19 + $0x98] sm:$0xff]   ;;  %v2393_v0 = vld [vmem:[%s2520_s19 + $0x90] sm:$0xff]   ;;  %v2396_v3 = vld [vmem:[%s2520_s19 + $0x8] sm:$0xff]  }
  0x2d   : > { %2263 = vmatprep.subr.bf16.mxu1 %v2359_v22  ;;  %v2397_v4 = vld [vmem:[%s2520_s19 + $0x88] sm:$0xff]   ;;  %v2398_v5 = vld [vmem:[%s2520_s19 + $0x40] sm:$0xff]   ;;  %v694_v10 = vld [vmem:[%s2510_s12 + $0x18] sm:$0xff] }
  0x2e   : > { %v2399_v6 = vld [vmem:[%s2520_s19 + $0xc0] sm:$0xff]   ;;  %v692_v9 = vld [vmem:[%s2510_s12 + $0x8] sm:$0xff]  ;;  %v698_v12 = vpack.c.bf16 %v694_v10, %v694_v10  ;;  %v693_v14 = vld [vmem:[%s2510_s12 + $0x10] sm:$0xff] }
  0x2f   : > { %2242 = vmatpush3.bf16.msra.mxu0 %v2360_v23  ;;  %v2400_v7 = vld [vmem:[%s2520_s19] sm:$0xff]   ;;  %v696_v11 = vpack.c.bf16 %v692_v9, %v692_v9  ;;  %v697_v16 = vpack.c.bf16 %v693_v14, %v693_v14  ;;  %v690_v37 = vld [vmem:[#allocation3] sm:$0xff] }
  0x30   : > { %2264 = vmatpush3.bf16.msra.mxu1 %v2361_v24  ;;  %2243 = vmatprep.subr.bf16.mxu0 %v2362_v25  ;;  %v2401_v8 = vld [vmem:[%s2520_s19 + $0x80] sm:$0xff]  }
  0x31   : > { %2265 = vmatprep.subr.bf16.mxu1 %v2363_v26  ;;  %v691_v13 = vld [vmem:[%s2510_s12] sm:$0xff] }
  0x32   : > { %v695_v15 = vpack.c.bf16 %v691_v13, %v691_v13  ;;  %v342_v23 = vld [vmem:[#allocation2] sm:$0xff] }
  0x33   : > { %2244 = vmatpush3.bf16.msra.mxu0 %v2364_v27 }
  0x34   : > { %2266 = vmatpush3.bf16.msra.mxu1 %v2365_v28  ;;  %2245 = vmatprep.subr.bf16.mxu0 %v2366_v29 }
  0x35   : > { %2267 = vmatprep.subr.bf16.mxu1 %v2367_v30 }
  0x37   : > { %2246 = vmatpush3.bf16.msra.mxu0 %v2368_v31 }
  0x38   : > { %2268 = vmatpush3.bf16.msra.mxu1 %v2369_v32  ;;  %2275 = vmatprep.subr.bf16.mxu0 %v2370_v41 }
  0x39   : > { %2297 = vmatprep.subr.bf16.mxu1 %v2371_v42 }
  0x3a   : > { %640 = vmatmul.mubr.bf16.vlgmr.msra.gmra.mxu0 %v347_v38 }
  0x3b   : > { %680 = vmatmul.mubr.bf16.vlgmr.msra.gmra.mxu1 %v349_v40  ;;  %2276 = vmatpush3.bf16.msra.mxu0 %v2372_v43 }
  0x3c   : > { %2298 = vmatpush3.bf16.msra.mxu1 %v2373_v44  ;;  %2277 = vmatprep.subr.bf16.mxu0 %v2374_v45 }
  0x3d   : > { %2299 = vmatprep.subr.bf16.mxu1 %v2375_v46  ;;  %987 = vmatprep.mubr.bf16.mxu0 %v696_v11 }
  0x3e   : > { %1027 = vmatprep.mubr.bf16.mxu1 %v698_v12 }
  0x3f   : > { %2278 = vmatpush3.bf16.msra.mxu0 %v2376_v47 }
  0x40   : > { %2300 = vmatpush3.bf16.msra.mxu1 %v2377_v48  ;;  %2279 = vmatprep.subr.bf16.mxu0 %v2378_v49 }
  0x41   : > { %2301 = vmatprep.subr.bf16.mxu1 %v2379_v50 }
  0x43   : > { %2280 = vmatpush3.bf16.msra.mxu0 %v2380_v51 }
  0x44   : > { %2302 = vmatpush3.bf16.msra.mxu1 %v2381_v52  ;;  %2281 = vmatprep.subr.bf16.mxu0 %v2382_v53 }
  0x45   : > { %2303 = vmatprep.subr.bf16.mxu1 %v2383_v54 }
  0x47   : > { %2282 = vmatpush3.bf16.msra.mxu0 %v2384_v55 }
  0x48   : > { %2304 = vmatpush3.bf16.msra.mxu1 %v2385_v56  ;;  %2283 = vmatprep.subr.bf16.mxu0 %v2386_v57 }
  0x49   : > { %2305 = vmatprep.subr.bf16.mxu1 %v2387_v58 }
  0x4b   : > { %2284 = vmatpush3.bf16.msra.mxu0 %v2388_v59 }
  0x4c   : > { %2306 = vmatpush3.bf16.msra.mxu1 %v2389_v60  ;;  %2285 = vmatprep.subr.bf16.mxu0 %v2390_v61 }
  0x4d   : > { %2307 = vmatprep.subr.bf16.mxu1 %v2391_v62 }
  0x4f   : > { %2286 = vmatpush3.bf16.msra.mxu0 %v2392_v63 }
  0x50   : > { %2308 = vmatpush3.bf16.msra.mxu1 %v2393_v0  ;;  %2287 = vmatprep.subr.bf16.mxu0 %v2394_v1 }
  0x51   : > { %2309 = vmatprep.subr.bf16.mxu1 %v2395_v2 }
  0x53   : > { %2288 = vmatpush3.bf16.msra.mxu0 %v2396_v3 }
  0x54   : > { %2310 = vmatpush3.bf16.msra.mxu1 %v2397_v4  ;;  %2289 = vmatprep.subr.bf16.mxu0 %v2398_v5 }
  0x55   : > { %2311 = vmatprep.subr.bf16.mxu1 %v2399_v6 }
  0x57   : > { %2290 = vmatpush3.bf16.msra.mxu0 %v2400_v7 }
  0x58   : > { %2312 = vmatpush3.bf16.msra.mxu1 %v2401_v8 }
  0x5a   : > { %988 = vmatmul.mubr.bf16.vlgmr.msra.gmra.mxu0 %v695_v15 }
  0x5b   : > { %1028 = vmatmul.mubr.bf16.vlgmr.msra.gmra.mxu1 %v697_v16 }
  0xfa   : > { %v2247_v17 = vpop.f32.mrf.mxu0 }
  0xfb   : > { %v2269_v18 = vpop.f32.mrf.mxu1 }
  0xfc   : > { %v2248_v19 = vpop.f32.mrf.mxu0 }
  0xfd   : > { %v2270_v20 = vpop.f32.mrf.mxu1  ;;  %v2249_v21 = vadd.f32 %v2248_v19, %v2247_v17 }
  0xfe   : > { %v2271_v22 = vadd.f32 %v2270_v20, %v2269_v18  ;;  %v2250_v24 = vpop.f32.mrf.mxu0 }
  0xff   : > { %v2272_v25 = vpop.f32.mrf.mxu1 }
 0x100   : > { %v682_v26 = vadd.f32 %v2271_v22, %v2249_v21  ;;  %v2251_v27 = vpop.f32.mrf.mxu0 }
 0x101   : > { %v2273_v28 = vpop.f32.mrf.mxu1 }
 0x102   : > { %v687_v29 = vadd.f32 %v682_v26, %v342_v23 }
 0x104   : > { %689 = vst.msk [vmem:[#allocation2] sm:$0xff] %vm688_vm1, %v687_v29 }
 0x11a   : > { %v2291_v30 = vpop.f32.mrf.mxu0 }
 0x11b   : > { %v2313_v31 = vpop.f32.mrf.mxu1 }
 0x11c   : > { %v2292_v32 = vpop.f32.mrf.mxu0 }
 0x11d   : > { %v2293_v33 = vadd.f32 %v2292_v32, %v2291_v30  ;;  %v2314_v34 = vpop.f32.mrf.mxu1 }
 0x11e   : > { %v2315_v35 = vadd.f32 %v2314_v34, %v2313_v31  ;;  %v2294_v36 = vpop.f32.mrf.mxu0 }
 0x11f   : > { %v2316_v38 = vpop.f32.mrf.mxu1 }
 0x120   : > { %v1030_v39 = vadd.f32 %v2315_v35, %v2293_v33  ;;  %v2295_v40 = vpop.f32.mrf.mxu0  ;;  %1040 = sbr.rel (%p2154_p6) target bundleno = 938 (0x3aa), region = 56 }
 0x121   : > { %v2317_v41 = vpop.f32.mrf.mxu1 }
 0x122   : > { %v1035_v42 = vadd.f32 %v1030_v39, %v690_v37 }
 0x124   : > { %1036 = vst.msk [vmem:[#allocation3] sm:$0xff] %vm688_vm1, %v1035_v42 }
 0x125   : > { %v1067_v43 = vld [vmem:[%s2868_s5 + $0xc0] sm:$0xff]  ;;  %v1068_v45 = vld [vmem:[%s2868_s5 + $0xc8] sm:$0xff]  ;;  %v2445_v51 = vmov 0   ;;  %v1069_v10 = vld [vmem:[%s2868_s5 + $0xd0] sm:$0xff]  ;;  %vm1993_vm2 = vcmask 64512  }
 0x126   : > { %v1071_v44 = vld [vmem:[%s2868_s5 + $0xe0] sm:$0xff]  ;;  %v1072_v47 = vld [vmem:[%s2868_s5 + $0xe8] sm:$0xff]  ;;  %1270 = vmatprep.mubr.bf16.mxu0 %v2445_v51  ;;  %1311 = vmatprep.mubr.bf16.mxu1 %v2445_v51  ;;  %v1073_v11 = vld [vmem:[%s2868_s5 + $0xf0] sm:$0xff] }
 0x127   : > { %v2180_v46 = vcombine.high %v1067_v43, %v1071_v44  ;;  %v2179_v48 = vcombine.low %v1067_v43, %v1071_v44  ;;  %v1059_v49 = vld [vmem:[%s2868_s5 + $0x80] sm:$0xff]  ;;  %v2182_v52 = vcombine.high %v1068_v45, %v1072_v47  ;;  %v2181_v53 = vcombine.low %v1068_v45, %v1072_v47  ;;  %v1060_v55 = vld [vmem:[%s2868_s5 + $0x88] sm:$0xff]  ;;  %v1070_v12 = vld [vmem:[%s2868_s5 + $0xd8] sm:$0xff] }
 0x128   : > { %v1063_v50 = vld [vmem:[%s2868_s5 + $0xa0] sm:$0xff]  ;;  %v1064_v56 = vld [vmem:[%s2868_s5 + $0xa8] sm:$0xff]  ;;  %v1074_v13 = vld [vmem:[%s2868_s5 + $0xf8] sm:$0xff]  ;;  %v2184_v17 = vcombine.high %v1069_v10, %v1073_v11  ;;  %v2183_v24 = vcombine.low %v1069_v10, %v1073_v11 }
 0x129   : > { %v2172_v54 = vcombine.high %v1059_v49, %v1063_v50  ;;  %v1051_v57 = vld [vmem:[%s2868_s5 + $0x40] sm:$0xff]  ;;  %1246 = vmatprep.subr.bf16.mxu0 %v2180_v46  ;;  %v2174_v58 = vcombine.high %v1060_v55, %v1064_v56  ;;  %v1052_v60 = vld [vmem:[%s2868_s5 + $0x48] sm:$0xff]  ;;  %1287 = vmatprep.subr.bf16.mxu1 %v2182_v52  ;;  %v2171_v62 = vcombine.low %v1059_v49, %v1063_v50  ;;  %v1061_v19 = vld [vmem:[%s2868_s5 + $0x90] sm:$0xff] }
 0x12a   : > { %v1055_v59 = vld [vmem:[%s2868_s5 + $0x60] sm:$0xff]  ;;  %v1056_v61 = vld [vmem:[%s2868_s5 + $0x68] sm:$0xff]  ;;  %1247 = vmatpush1.bf16.msra.mxu0 %v2179_v48  ;;  %1288 = vmatpush1.bf16.msra.mxu1 %v2181_v53  ;;  %v2173_v63 = vcombine.low %v1060_v55, %v1064_v56  ;;  %v2186_v18 = vcombine.high %v1070_v12, %v1074_v13  ;;  %v1065_v20 = vld [vmem:[%s2868_s5 + $0xb0] sm:$0xff]  ;;  %v2185_v25 = vcombine.low %v1070_v12, %v1074_v13 }
 0x12b   : > { %1248 = vmatprep.subr.bf16.mxu0 %v2172_v54  ;;  %v2164_v0 = vcombine.high %v1051_v57, %v1055_v59  ;;  %1289 = vmatprep.subr.bf16.mxu1 %v2174_v58  ;;  %v2166_v1 = vcombine.high %v1052_v60, %v1056_v61  ;;  %v1043_v2 = vld [vmem:[%s2868_s5] sm:$0xff]  ;;  %v1044_v4 = vld [vmem:[%s2868_s5 + $0x8] sm:$0xff]  ;;  %v2163_v6 = vcombine.low %v1051_v57, %v1055_v59  ;;  %v1062_v22 = vld [vmem:[%s2868_s5 + $0x98] sm:$0xff] }
 0x12c   : > { %v1047_v3 = vld [vmem:[%s2868_s5 + $0x20] sm:$0xff]  ;;  %v1048_v5 = vld [vmem:[%s2868_s5 + $0x28] sm:$0xff]  ;;  %v2165_v7 = vcombine.low %v1052_v60, %v1056_v61  ;;  %v1066_v23 = vld [vmem:[%s2868_s5 + $0xb8] sm:$0xff]  ;;  %v2176_v26 = vcombine.high %v1061_v19, %v1065_v20  ;;  %v2175_v32 = vcombine.low %v1061_v19, %v1065_v20 }
 0x12d   : > { %v2156_v8 = vcombine.high %v1043_v2, %v1047_v3  ;;  %v2158_v9 = vcombine.high %v1044_v4, %v1048_v5  ;;  %v2155_v14 = vcombine.low %v1043_v2, %v1047_v3  ;;  %v1041_v15 = vld [vmem:[#allocation2] sm:$0xff]  ;;  %v2157_v16 = vcombine.low %v1044_v4, %v1048_v5  ;;  %v1053_v28 = vld [vmem:[%s2868_s5 + $0x50] sm:$0xff]  ;;  %v1054_v30 = vld [vmem:[%s2868_s5 + $0x58] sm:$0xff] }
 0x12e   : > { %1249 = vmatpush1.bf16.msra.mxu0 %v2171_v62  ;;  %1290 = vmatpush1.bf16.msra.mxu1 %v2173_v63  ;;  %v2666_v21 = vpack.c.bf16 %v1041_v15, %v1041_v15  ;;  %v2178_v27 = vcombine.high %v1062_v22, %v1066_v23  ;;  %v1057_v29 = vld [vmem:[%s2868_s5 + $0x70] sm:$0xff]  ;;  %v1058_v31 = vld [vmem:[%s2868_s5 + $0x78] sm:$0xff]  ;;  %v2177_v33 = vcombine.low %v1062_v22, %v1066_v23  ;;  %v1428_v44 = vld [vmem:[%s2869_s6 + $0xc0] sm:$0xff] }
 0x12f   : > { %1250 = vmatprep.subr.bf16.mxu0 %v2164_v0  ;;  %1291 = vmatprep.subr.bf16.mxu1 %v2166_v1  ;;  %v2168_v34 = vcombine.high %v1053_v28, %v1057_v29  ;;  %v2170_v35 = vcombine.high %v1054_v30, %v1058_v31  ;;  %v1045_v36 = vld [vmem:[%s2868_s5 + $0x10] sm:$0xff]  ;;  %v1046_v38 = vld [vmem:[%s2868_s5 + $0x18] sm:$0xff]  ;;  %v2167_v40 = vcombine.low %v1053_v28, %v1057_v29  ;;  %v1432_v45 = vld [vmem:[%s2869_s6 + $0xe0] sm:$0xff] }
 0x130   : > { %v1049_v37 = vld [vmem:[%s2868_s5 + $0x30] sm:$0xff]  ;;  %v1050_v39 = vld [vmem:[%s2868_s5 + $0x38] sm:$0xff]  ;;  %v2169_v41 = vcombine.low %v1054_v30, %v1058_v31  ;;  %v1429_v46 = vld [vmem:[%s2869_s6 + $0xc8] sm:$0xff]  ;;  %v2216_v50 = vcombine.high %v1428_v44, %v1432_v45  ;;  %v2215_v57 = vcombine.low %v1428_v44, %v1432_v45 }
 0x131   : > { %v2160_v42 = vcombine.high %v1045_v36, %v1049_v37  ;;  %v2162_v43 = vcombine.high %v1046_v38, %v1050_v39  ;;  %v1433_v47 = vld [vmem:[%s2869_s6 + $0xe8] sm:$0xff]  ;;  %v2159_v48 = vcombine.low %v1045_v36, %v1049_v37  ;;  %v2161_v49 = vcombine.low %v1046_v38, %v1050_v39  ;;  %v1420_v53 = vld [vmem:[%s2869_s6 + $0x80] sm:$0xff]  ;;  %v1430_v13 = vld [vmem:[%s2869_s6 + $0xd0] sm:$0xff] }
 0x132   : > { %1251 = vmatpush1.bf16.msra.mxu0 %v2163_v6  ;;  %1292 = vmatpush1.bf16.msra.mxu1 %v2165_v7  ;;  %v2218_v52 = vcombine.high %v1429_v46, %v1433_v47  ;;  %v1424_v54 = vld [vmem:[%s2869_s6 + $0xa0] sm:$0xff]  ;;  %v1421_v55 = vld [vmem:[%s2869_s6 + $0x88] sm:$0xff]  ;;  %v2217_v58 = vcombine.low %v1429_v46, %v1433_v47  ;;  %v1431_v15 = vld [vmem:[%s2869_s6 + $0xd8] sm:$0xff] }
 0x133   : > { %1252 = vmatprep.subr.bf16.mxu0 %v2156_v8  ;;  %1293 = vmatprep.subr.bf16.mxu1 %v2158_v9  ;;  %v1425_v56 = vld [vmem:[%s2869_s6 + $0xa8] sm:$0xff]  ;;  %v2208_v59 = vcombine.high %v1420_v53, %v1424_v54  ;;  %v1412_v61 = vld [vmem:[%s2869_s6 + $0x40] sm:$0xff]  ;;  %v2207_v1 = vcombine.low %v1420_v53, %v1424_v54  ;;  %v1422_v22 = vld [vmem:[%s2869_s6 + $0x90] sm:$0xff] }
 0x134   : > { %v2210_v60 = vcombine.high %v1421_v55, %v1425_v56  ;;  %v1416_v62 = vld [vmem:[%s2869_s6 + $0x60] sm:$0xff]  ;;  %v1413_v63 = vld [vmem:[%s2869_s6 + $0x48] sm:$0xff]  ;;  %v2209_v2 = vcombine.low %v1421_v55, %v1425_v56  ;;  %v1426_v23 = vld [vmem:[%s2869_s6 + $0xb0] sm:$0xff] }
 0x135   : > { %v1417_v0 = vld [vmem:[%s2869_s6 + $0x68] sm:$0xff]  ;;  %v2200_v3 = vcombine.high %v1412_v61, %v1416_v62  ;;  %v1404_v5 = vld [vmem:[%s2869_s6] sm:$0xff]  ;;  %v2199_v9 = vcombine.low %v1412_v61, %v1416_v62  ;;  %v2212_v29 = vcombine.high %v1422_v22, %v1426_v23  ;;  %v1414_v31 = vld [vmem:[%s2869_s6 + $0x50] sm:$0xff] }
 0x136   : > { %1253 = vmatpush1.bf16.msra.mxu0 %v2155_v14  ;;  %1294 = vmatpush1.bf16.msra.mxu1 %v2157_v16  ;;  %v2202_v4 = vcombine.high %v1413_v63, %v1417_v0  ;;  %v1408_v6 = vld [vmem:[%s2869_s6 + $0x20] sm:$0xff]  ;;  %v1405_v7 = vld [vmem:[%s2869_s6 + $0x8] sm:$0xff]  ;;  %v2201_v10 = vcombine.low %v1413_v63, %v1417_v0  ;;  %v1434_v14 = vld [vmem:[%s2869_s6 + $0xf0] sm:$0xff] }
 0x137   : > { %1328 = vmatprep.subr.bf16.mxu0 %v2184_v17  ;;  %1369 = vmatprep.subr.bf16.mxu1 %v2186_v18  ;;  %v1409_v8 = vld [vmem:[%s2869_s6 + $0x28] sm:$0xff]  ;;  %v2192_v11 = vcombine.high %v1404_v5, %v1408_v6  ;;  %v1435_v16 = vld [vmem:[%s2869_s6 + $0xf8] sm:$0xff]  ;;  %v2191_v17 = vcombine.low %v1404_v5, %v1408_v6  ;;  %v2220_v20 = vcombine.high %v1430_v13, %v1434_v14  ;;  %v1406_v39 = vld [vmem:[%s2869_s6 + $0x10] sm:$0xff] }
 0x138   : > { %v2194_v12 = vcombine.high %v1405_v7, %v1409_v8  ;;  %v1402_v18 = vld [vmem:[#allocation3] sm:$0xff]  ;;  %v2193_v19 = vcombine.low %v1405_v7, %v1409_v8  ;;  %v2221_v28 = vcombine.low %v1431_v15, %v1435_v16 }
 0x139   : > { %2187 = vmatmul.mubr.msk.bf16.vlgmr.msra.gmra.mxu0 %vm688_vm1, %v2666_v21  ;;  %2188 = vmatmul.mubr.msk.bf16.vlgmr.msra.gmra.mxu1 %vm688_vm1, %v2666_v21 }
 0x13a   : > { %1329 = vmatpush1.bf16.msra.mxu0 %v2183_v24  ;;  %1370 = vmatpush1.bf16.msra.mxu1 %v2185_v25  ;;  %v1403_v24 = vpack.c.bf16 %v1402_v18, %v1402_v18  ;;  %v1423_v25 = vld [vmem:[%s2869_s6 + $0x98] sm:$0xff] }
 0x13b   : > { %1330 = vmatprep.subr.bf16.mxu0 %v2176_v26  ;;  %1371 = vmatprep.subr.bf16.mxu1 %v2178_v27  ;;  %v1427_v26 = vld [vmem:[%s2869_s6 + $0xb8] sm:$0xff]  ;;  %v2219_v27 = vcombine.low %v1430_v13, %v1434_v14 }
 0x13c   : > { %1352 = vmatprep.mubr.bf16.mxu0 %v2445_v51  ;;  %1393 = vmatprep.mubr.bf16.mxu1 %v2445_v51  ;;  %v2214_v30 = vcombine.high %v1423_v25, %v1427_v26  ;;  %v2213_v36 = vcombine.low %v1423_v25, %v1427_v26 }
 0x13e   : > { %1331 = vmatpush1.bf16.msra.mxu0 %v2175_v32  ;;  %1372 = vmatpush1.bf16.msra.mxu1 %v2177_v33  ;;  %v1418_v32 = vld [vmem:[%s2869_s6 + $0x70] sm:$0xff]  ;;  %v1415_v33 = vld [vmem:[%s2869_s6 + $0x58] sm:$0xff] }
 0x13f   : > { %1332 = vmatprep.subr.bf16.mxu0 %v2168_v34  ;;  %1373 = vmatprep.subr.bf16.mxu1 %v2170_v35  ;;  %v1419_v34 = vld [vmem:[%s2869_s6 + $0x78] sm:$0xff]  ;;  %v2211_v35 = vcombine.low %v1422_v22, %v1426_v23  ;;  %v2204_v37 = vcombine.high %v1414_v31, %v1418_v32 }
 0x140   : > { %v2206_v38 = vcombine.high %v1415_v33, %v1419_v34  ;;  %v2205_v44 = vcombine.low %v1415_v33, %v1419_v34 }
 0x142   : > { %1333 = vmatpush1.bf16.msra.mxu0 %v2167_v40  ;;  %1374 = vmatpush1.bf16.msra.mxu1 %v2169_v41  ;;  %v1410_v40 = vld [vmem:[%s2869_s6 + $0x30] sm:$0xff]  ;;  %v1407_v41 = vld [vmem:[%s2869_s6 + $0x18] sm:$0xff] }
 0x143   : > { %1334 = vmatprep.subr.bf16.mxu0 %v2160_v42  ;;  %1375 = vmatprep.subr.bf16.mxu1 %v2162_v43  ;;  %v1411_v42 = vld [vmem:[%s2869_s6 + $0x38] sm:$0xff]  ;;  %v2203_v43 = vcombine.low %v1414_v31, %v1418_v32  ;;  %v2196_v45 = vcombine.high %v1406_v39, %v1410_v40  ;;  %v2195_v47 = vcombine.low %v1406_v39, %v1410_v40 }
 0x144   : > { %v2198_v46 = vcombine.high %v1407_v41, %v1411_v42 }
 0x146   : > { %1335 = vmatpush1.bf16.msra.mxu0 %v2159_v48  ;;  %1376 = vmatpush1.bf16.msra.mxu1 %v2161_v49  ;;  %v2197_v48 = vcombine.low %v1407_v41, %v1411_v42 }
 0x147   : > { %1607 = vmatprep.subr.bf16.mxu0 %v2216_v50  ;;  %1648 = vmatprep.subr.bf16.mxu1 %v2218_v52 }
 0x149   : > { %2189 = vmatmul.mubr.msk.bf16.vlgmr.msra.gmra.mxu0 %vm688_vm1, %v2666_v21  ;;  %2190 = vmatmul.mubr.msk.bf16.vlgmr.msra.gmra.mxu1 %vm688_vm1, %v2666_v21  ;;  %v2222_v21 = vcombine.high %v1431_v15, %v1435_v16 }
 0x14a   : > { %1608 = vmatpush1.bf16.msra.mxu0 %v2215_v57  ;;  %1649 = vmatpush1.bf16.msra.mxu1 %v2217_v58 }
 0x14b   : > { %1609 = vmatprep.subr.bf16.mxu0 %v2208_v59  ;;  %1650 = vmatprep.subr.bf16.mxu1 %v2210_v60 }
 0x14c   : > { %1631 = vmatprep.mubr.bf16.mxu0 %v2445_v51  ;;  %1672 = vmatprep.mubr.bf16.mxu1 %v2445_v51 }
 0x14e   : > { %1610 = vmatpush1.bf16.msra.mxu0 %v2207_v1  ;;  %1651 = vmatpush1.bf16.msra.mxu1 %v2209_v2 }
 0x14f   : > { %1611 = vmatprep.subr.bf16.mxu0 %v2200_v3  ;;  %1652 = vmatprep.subr.bf16.mxu1 %v2202_v4 }
 0x152   : > { %1612 = vmatpush1.bf16.msra.mxu0 %v2199_v9  ;;  %1653 = vmatpush1.bf16.msra.mxu1 %v2201_v10 }
 0x153   : > { %1613 = vmatprep.subr.bf16.mxu0 %v2192_v11  ;;  %1654 = vmatprep.subr.bf16.mxu1 %v2194_v12 }
 0x156   : > { %1614 = vmatpush1.bf16.msra.mxu0 %v2191_v17  ;;  %1655 = vmatpush1.bf16.msra.mxu1 %v2193_v19 }
 0x157   : > { %1689 = vmatprep.subr.bf16.mxu0 %v2220_v20  ;;  %1730 = vmatprep.subr.bf16.mxu1 %v2222_v21 }
 0x159   : > { %2223 = vmatmul.mubr.msk.bf16.vlgmr.msra.gmra.mxu0 %vm688_vm1, %v1403_v24  ;;  %2224 = vmatmul.mubr.msk.bf16.vlgmr.msra.gmra.mxu1 %vm688_vm1, %v1403_v24 }
 0x15a   : > { %1690 = vmatpush1.bf16.msra.mxu0 %v2219_v27  ;;  %1731 = vmatpush1.bf16.msra.mxu1 %v2221_v28 }
 0x15b   : > { %1691 = vmatprep.subr.bf16.mxu0 %v2212_v29  ;;  %1732 = vmatprep.subr.bf16.mxu1 %v2214_v30 }
 0x15c   : > { %1713 = vmatprep.mubr.bf16.mxu0 %v2445_v51  ;;  %1754 = vmatprep.mubr.bf16.mxu1 %v2445_v51  ;;  %v1986_v51 = vstv %s1985_s16 }
 0x15d   : > { %v1987_v49 = vmul.f32 1.442695, %v1986_v51 }
 0x15e   : > { %1692 = vmatpush1.bf16.msra.mxu0 %v2211_v35  ;;  %1733 = vmatpush1.bf16.msra.mxu1 %v2213_v36 }
 0x15f   : > { %1693 = vmatprep.subr.bf16.mxu0 %v2204_v37  ;;  %1734 = vmatprep.subr.bf16.mxu1 %v2206_v38  ;;  %2402 = vpow2.f32 %v1987_v49 }
 0x162   : > { %1694 = vmatpush1.bf16.msra.mxu0 %v2203_v43  ;;  %1735 = vmatpush1.bf16.msra.mxu1 %v2205_v44 }
 0x163   : > { %1695 = vmatprep.subr.bf16.mxu0 %v2196_v45  ;;  %1736 = vmatprep.subr.bf16.mxu1 %v2198_v46 }
 0x166   : > { %1696 = vmatpush1.bf16.msra.mxu0 %v2195_v47  ;;  %1737 = vmatpush1.bf16.msra.mxu1 %v2197_v48 }
 0x169   : > { %2225 = vmatmul.mubr.msk.bf16.vlgmr.msra.gmra.mxu0 %vm688_vm1, %v1403_v24  ;;  %2226 = vmatmul.mubr.msk.bf16.vlgmr.msra.gmra.mxu1 %vm688_vm1, %v1403_v24 }
 0x16c   : > { %v2403_v50 = vpop.eup %2402 }
 0x16d   : > { %2319 = vpush %v2403_v50 }
 0x19e   : > { %s2320_s17 = spop %2319 }
 0x1f9   : > { %v2812_v52 = vpop.f32.mrf.mxu0  ;;  %v2814_v53 = vpop.f32.mrf.mxu1 }
 0x1fa   : > { %v1763_v9 = vmul.f32 %v2812_v52, %v2812_v52  ;;  %v1765_v17 = vmul.f32 %v2814_v53, %v2814_v53 }
 0x1fb   : > { %v1274_v54 = vpop.f32.mrf.mxu0  ;;  %v1315_v56 = vpop.f32.mrf.mxu1 }
 0x1fc   : > { %v1818_v55 = vpack.c.bf16 %v1274_v54, %v1274_v54  ;;  %v1820_v57 = vpack.c.bf16 %v1315_v56, %v1315_v56  ;;  %v1764_v10 = vmul.f32 %v1274_v54, %v1274_v54  ;;  %v1766_v22 = vmul.f32 %v1315_v56, %v1315_v56 }
 0x1fd   : > { %v1276_v58 = vpop.f32.mrf.mxu0  ;;  %v1317_v59 = vpop.f32.mrf.mxu1 }
 0x1fe   : > { %1857 = vmatprep.mubr.bf16.mxu0 %v1818_v55  ;;  %1897 = vmatprep.mubr.bf16.mxu1 %v1820_v57  ;;  %v1771_v18 = vadd.f32 %v1764_v10, %v1763_v9 }
 0x1ff   : > { %v1277_v60 = vpop.f32.mrf.mxu0  ;;  %v1318_v61 = vpop.f32.mrf.mxu1 }
 0x200   : > { %v1772_v23 = vadd.f32 %v1771_v18, %v1765_v17 }
 0x202   : > { %v1773_v27 = vadd.f32 %v1772_v23, %v1766_v22 }
 0x209   : > { %v2816_v62 = vpop.f32.mrf.mxu0  ;;  %v2818_v63 = vpop.f32.mrf.mxu1 }
 0x20a   : > { %v1767_v24 = vmul.f32 %v2816_v62, %v2816_v62  ;;  %v1769_v40 = vmul.f32 %v2818_v63, %v2818_v63 }
 0x20b   : > { %v2820_v0 = vpop.f32.mrf.mxu0  ;;  %v2822_v1 = vpop.f32.mrf.mxu1 }
 0x20c   : > { %v1774_v29 = vadd.f32 %v1773_v27, %v1767_v24  ;;  %v1768_v30 = vmul.f32 %v2820_v0, %v2820_v0  ;;  %v1770_v48 = vmul.f32 %v2822_v1, %v2822_v1 }
 0x20d   : > { %v1358_v2 = vpop.f32.mrf.mxu0  ;;  %v1399_v3 = vpop.f32.mrf.mxu1 }
 0x20e   : > { %v1775_v41 = vadd.f32 %v1774_v29, %v1768_v30 }
 0x20f   : > { %v1359_v4 = vpop.f32.mrf.mxu0  ;;  %v1400_v5 = vpop.f32.mrf.mxu1 }
 0x210   : > { %v1776_v49 = vadd.f32 %v1775_v41, %v1769_v40 }
 0x212   : > { %v1777_v50 = vadd.f32 %v1776_v49, %v1770_v48 }
 0x219   : > { %v1633_v6 = vpop.f32.mrf.mxu0  ;;  %v1674_v7 = vpop.f32.mrf.mxu1 }
 0x21a   : > { %v1782_v13 = vmul.f32 %v1633_v6, %v1633_v6  ;;  %v1784_v20 = vmul.f32 %v1674_v7, %v1674_v7 }
 0x21b   : > { %v1635_v8 = vpop.f32.mrf.mxu0  ;;  %v1676_v11 = vpop.f32.mrf.mxu1 }
 0x21c   : > { %v1783_v14 = vmul.f32 %v1635_v8, %v1635_v8  ;;  %v1785_v25 = vmul.f32 %v1676_v11, %v1676_v11 }
 0x21d   : > { %v1637_v12 = vpop.f32.mrf.mxu0  ;;  %v1678_v15 = vpop.f32.mrf.mxu1 }
 0x21e   : > { %v1790_v21 = vadd.f32 %v1783_v14, %v1782_v13  ;;  %v1824_v15 = vpack.c.bf16 %v2822_v1, %v2822_v1 }
 0x21f   : > { %v1638_v16 = vpop.f32.mrf.mxu0  ;;  %v1679_v19 = vpop.f32.mrf.mxu1 }
 0x220   : > { %v1791_v26 = vadd.f32 %v1790_v21, %v1784_v20 }
 0x222   : > { %v1792_v31 = vadd.f32 %v1791_v26, %v1785_v25 }
 0x229   : > { %v1715_v28 = vpop.f32.mrf.mxu0  ;;  %v1756_v33 = vpop.f32.mrf.mxu1 }
 0x22a   : > { %v1786_v32 = vmul.f32 %v1715_v28, %v1715_v28  ;;  %v1788_v36 = vmul.f32 %v1756_v33, %v1756_v33 }
 0x22b   : > { %v1717_v34 = vpop.f32.mrf.mxu0  ;;  %v1758_v38 = vpop.f32.mrf.mxu1 }
 0x22c   : > { %v1793_v35 = vadd.f32 %v1792_v31, %v1786_v32  ;;  %v1787_v37 = vmul.f32 %v1717_v34, %v1717_v34  ;;  %v1789_v45 = vmul.f32 %v1758_v38, %v1758_v38 }
 0x22d   : > { %v1719_v39 = vpop.f32.mrf.mxu0  ;;  %v1760_v43 = vpop.f32.mrf.mxu1 }
 0x22e   : > { %v1794_v42 = vadd.f32 %v1793_v35, %v1787_v37 }
 0x22f   : > { %v1720_v44 = vpop.f32.mrf.mxu0  ;;  %v1761_v46 = vpop.f32.mrf.mxu1 }
 0x230   : > { %v1795_v47 = vadd.f32 %v1794_v42, %v1788_v36 }
 0x232   : > { %v1796_v51 = vadd.f32 %v1795_v47, %v1789_v45 }
 0x234   : > { %1797 = vadd.xlane.f32.xlu0 %v1796_v51 }
 0x238   : > { %1778 = vadd.xlane.f32.xlu0 %v1777_v50 }
 0x2bd   : > { %v1798_v54 = vpop.xlane.xlu0 %1797 }
 0x2be   : > { %v1799_v55 = vadd.f32 1e-12, %v1798_v54 }
 0x2c0   : > { %2404 = vrsqrt.f32 %v1799_v55 }
 0x2cd   : > { %v2405_v56 = vpop.eup %2404 }
 0x2ce   : > { %v1802_v57 = vmul.f32 %v2405_v56, %v1635_v8  ;;  %v1804_v58 = vmul.f32 %v2405_v56, %v1676_v11  ;;  %v1801_v59 = vmul.f32 %v2405_v56, %v1633_v6  ;;  %v1803_v60 = vmul.f32 %v2405_v56, %v1674_v7 }
 0x2cf   : > { %v1806_v61 = vmul.f32 %v2405_v56, %v1717_v34  ;;  %v1808_v2 = vmul.f32 %v2405_v56, %v1758_v38  ;;  %v1805_v13 = vmul.f32 %v2405_v56, %v1715_v28  ;;  %v1807_v14 = vmul.f32 %v2405_v56, %v1756_v33 }
 0x2d0   : > { %v1810_v3 = vpack.c.bf16 %v1802_v57, %v1802_v57  ;;  %v1812_v4 = vpack.c.bf16 %v1804_v58, %v1804_v58  ;;  %v1809_v5 = vpack.c.bf16 %v1801_v59, %v1801_v59  ;;  %v1811_v9 = vpack.c.bf16 %v1803_v60, %v1803_v60 }
 0x2d1   : > { %v1814_v10 = vpack.c.bf16 %v1806_v61, %v1806_v61  ;;  %v1816_v12 = vpack.c.bf16 %v1808_v2, %v1808_v2  ;;  %v1817_v6 = vpack.c.bf16 %v2812_v52, %v2812_v52  ;;  %v1819_v7 = vpack.c.bf16 %v2814_v53, %v2814_v53 }
 0x2d2   : > { %1839 = vmatprep.subr.bf16.mxu0 %v1810_v3  ;;  %1879 = vmatprep.subr.bf16.mxu1 %v1812_v4  ;;  %v1822_v8 = vpack.c.bf16 %v2820_v0, %v2820_v0  ;;  %v1813_v11 = vpack.c.bf16 %v1805_v13, %v1805_v13  ;;  %v1815_v16 = vpack.c.bf16 %v1807_v14, %v1807_v14  ;;  %v1779_v0 = vpop.xlane.xlu0 %1778 }
 0x2d3   : > { %1840 = vmatpush1.bf16.xpose.msra.mxu0 %v1809_v5  ;;  %1880 = vmatpush1.bf16.xpose.msra.mxu1 %v1811_v9  ;;  %v1821_v52 = vpack.c.bf16 %v2816_v62, %v2816_v62  ;;  %v1823_v53 = vpack.c.bf16 %v2818_v63, %v2818_v63  ;;  %v1780_v17 = vadd.f32 1e-12, %v1779_v0  ;;  %v1990_v62 = vstv %s2320_s17 }
 0x2d4   : > { %1919 = vmatprep.subr.bf16.mxu0 %v1814_v10  ;;  %1959 = vmatprep.subr.bf16.mxu1 %v1816_v12 }
 0x2d5   : > { %2406 = vrsqrt.f32 %v1780_v17 }
 0x2da   : > { %1858 = vmatmul.mubr.bf16.vlgmr.msra.gmra.mxu0 %v1817_v6  ;;  %1898 = vmatmul.mubr.bf16.vlgmr.msra.gmra.mxu1 %v1819_v7 }
 0x2db   : > { %1920 = vmatpush1.bf16.xpose.msra.mxu0 %v1813_v11  ;;  %1937 = vmatprep.mubr.bf16.mxu0 %v1822_v8 }
 0x2dc   : > { %1960 = vmatpush1.bf16.xpose.msra.mxu1 %v1815_v16  ;;  %1977 = vmatprep.mubr.bf16.mxu1 %v1824_v15 }
 0x2e2   : > { %1938 = vmatmul.mubr.bf16.vlgmr.msra.gmra.mxu0 %v1821_v52  ;;  %v2407_v26 = vpop.eup %2406 }
 0x2e3   : > { %1978 = vmatmul.mubr.bf16.vlgmr.msra.gmra.mxu1 %v1823_v53  ;;  %v1991_v30 = vmul.f32 %v2407_v26, %v1990_v62 }
 0x39a   : > { %v1859_v18 = vpop.f32.mrf.mxu0  ;;  %v1899_v1 = vpop.f32.mrf.mxu1 }
 0x39b   : > { %v1900_v25 = vadd.f32 %v1899_v1, %v1859_v18 }
 0x39c   : > { %v1861_v19 = vpop.f32.mrf.mxu0  ;;  %v1901_v20 = vpop.f32.mrf.mxu1 }
 0x39e   : > { %v1862_v21 = vpop.f32.mrf.mxu0  ;;  %v1902_v22 = vpop.f32.mrf.mxu1 }
 0x3a0   : > { %v1863_v23 = vpop.f32.mrf.mxu0  ;;  %v1903_v24 = vpop.f32.mrf.mxu1 }
 0x3a2   : > { %v1939_v27 = vpop.f32.mrf.mxu0 }
 0x3a3   : > { %v1940_v28 = vadd.f32 %v1939_v27, %v1900_v25  ;;  %v1979_v63 = vpop.f32.mrf.mxu1 }
 0x3a4   : > { %v1941_v29 = vpop.f32.mrf.mxu0 }
 0x3a5   : > { %v1980_v31 = vadd.f32 %v1979_v63, %v1940_v28  ;;  %v1981_v32 = vpop.f32.mrf.mxu1 }
 0x3a6   : > { %v1942_v33 = vpop.f32.mrf.mxu0 }
 0x3a7   : > { %v1992_v34 = vmul.f32 %v1991_v30, %v1980_v31  ;;  %v1982_v35 = vpop.f32.mrf.mxu1 }
 0x3a8   : > { %v1943_v36 = vpop.f32.mrf.mxu0 }
 0x3a9   : > { %1994 = vst.msk [vmem:[#allocation5] sm:$0xff] %vm1993_vm2, %v1992_v34  ;;  %v1983_v37 = vpop.f32.mrf.mxu1 }
 0x3aa PF: > { %p2325_p7 = scmp.eq.s32.totalorder %s2496_s27, 1  ;;  %s2446_s18 = smov [#allocation5]  }
 0x3ab   : > { %s2002_s19 = sshll.u32 %s2446_s18, 4  ;;  %s2003_s19 = int_to_ptr.vmem [resolvable:$true] %s2002_s19 }
 0x3ac   : > { %s2408_s20 = scalar_lea.vmem %s2003_s19, 128  ;;  %p2415_p11 = scmp.lt.s32.totalorder %s2003_s19, %s2003_s19 }
 0x3ad   : > { %p2409_p8 = scmp.ne.s32.totalorder %s2003_s19, %s2408_s20  ;;  %p2416_p12 = scmp.lt.s32.totalorder %s2408_s20, %s2408_s20 }
 0x3af   : > { %p2410_p9 = pnand %p2409_p8, %p2325_p7  ;;  %p2417_p13 = por %p2416_p12, %p2415_p11 }
 0x3b1   : > { %p2411_p10 = pneg %p2410_p9 }
 0x3b3   : > { %p2418_p0 = pnand %p2417_p13, %p2411_p10 }
 0x3b5   : > { %2421 = shalt.err (!%p2418_p0)
}
 0x3b6   : > { %2322 = dma.vmem_to_hbm [thread:$0]  (%p2325_p7), %s2003_s19, 128, %s2870_s7, [#allocation6]  }
 0x3b7   : > { %2437 = dma.done.wait (%p2325_p7), [#allocation6], 128  }
 0x3b8   : > { %2439 = vsyncadd (%p2325_p7), [#allocation6], 4294967168 }
 0x3b9 PF: > { %s19_s26 = sadd.s32 1, %s2442_s26  }
 0x3ba   : > { %p16_p1 = scmp.ge.s32.totalorder %s19_s26, 4  }
 0x3bc   :  { %18 = sbr.rel (!%p16_p1) target bundleno = 3 (0x3), region = 92 }
 0x3c1   :  { %2015 = vsyncpa [#allocation6], 1 }
 0x3c2   :  { %2017 = vsyncpa [#allocation6 + $0x1], 1 }

</bundles_post_ra>
